<compile_context>
chip_gen: v5e
topology: v5e:2x2
jax: 0.10.0
libtpu: 0.0.40
codegen_flags: <defaults>
</compile_context>

<pallas_src>
import jax
import jax.numpy as jnp
from jax.experimental import pallas as pl
from jax.experimental.pallas import tpu as pltpu

LANES = 128
_MAX_BLOCK_SUBLANES = 1024   # (3, 1024, 128) f32 block = 1.5 MiB

# Packed parameter layout (flat f32 vector, row-major flattening):
_W1 = 0    # w1[j, k] -> _W1 + 2*j + k   (6, 2)
_B1 = 12   # b1[j]                       (6,)
_W2 = 18   # w2[0, j]                    (1, 6)
_B2 = 24   # b2[0]                       (1,)
_WC = 25   # wc[0, k]                    (1, 2)
_W3 = 27   # w3[j, k] -> _W3 + 3*j + k   (12, 3)
_B3 = 63   # b3[j]                       (12,)
_W4 = 75   # w4[0, j]                    (1, 12)
_B4 = 87   # b4[0]                       (1,)
_NPARAMS = 88


def _tree_sum(vals):
    """Pairwise (tree) sum to expose ILP instead of one long serial chain."""
    while len(vals) > 1:
        nxt = [vals[i] + vals[i + 1] for i in range(0, len(vals) - 1, 2)]
        if len(vals) % 2:
            nxt.append(vals[-1])
        vals = nxt
    return vals[0]


def _lnet_kernel(p_ref, x_ref, out_ref):
    # x_ref block: (3, S, 128). Rows 0/1 = x_1 features, row 2 = x_2 feature,
    # batch packed densely on (sublane, lane).
    x1_0 = x_ref[0]
    x1_1 = x_ref[1]
    x2_0 = x_ref[2]

    # control (2 -> 1), no bias, no activation.
    out_ref[1] = p_ref[_WC] * x1_0 + p_ref[_WC + 1] * x1_1

    # layer1 (2 -> 6) + tanh, layer2 weight folded into each term,
    # then layer2 (6 -> 1) via tree sum + tanh.
    def h1_term(j):
        h = jnp.tanh(p_ref[_B1 + j]
                     + p_ref[_W1 + 2 * j] * x1_0
                     + p_ref[_W1 + 2 * j + 1] * x1_1)
        return p_ref[_W2 + j] * h

    acc1 = _tree_sum([h1_term(j) for j in range(6)]) + p_ref[_B2]
    out_ref[0] = jnp.tanh(acc1)

    # layer3 (3 -> 12) + tanh on concat(x_1, x_2) (split FMA, same math),
    # layer4 weight folded in, then layer4 (12 -> 1) via tree sum + tanh.
    def h2_term(j):
        h = jnp.tanh(p_ref[_B3 + j]
                     + p_ref[_W3 + 3 * j] * x1_0
                     + p_ref[_W3 + 3 * j + 1] * x1_1
                     + p_ref[_W3 + 3 * j + 2] * x2_0)
        return p_ref[_W4 + j] * h

    acc2 = _tree_sum([h2_term(j) for j in range(12)]) + p_ref[_B4]
    out_ref[2] = jnp.tanh(acc2)


def pack_params(p):
    """One-time packing of all weights/biases into a single flat f32 vector."""
    packed = jnp.concatenate([
        p["w1"].reshape(-1), p["b1"].reshape(-1),
        p["w2"].reshape(-1), p["b2"].reshape(-1),
        p["wc"].reshape(-1),
        p["w3"].reshape(-1), p["b3"].reshape(-1),
        p["w4"].reshape(-1), p["b4"].reshape(-1),
    ]).astype(jnp.float32)
    assert packed.shape == (_NPARAMS,)
    return packed


def _choose_tiling(batch):
    """Pick (sublanes_per_block S, n_tiles): big blocks, even grid when >1."""
    sublanes = -(-batch // LANES)                # sublanes needed
    sublanes = max(8, -(-sublanes // 8) * 8)     # multiple of 8, >= 8
    if sublanes <= _MAX_BLOCK_SUBLANES:
        return sublanes, 1
    n_tiles = -(-sublanes // _MAX_BLOCK_SUBLANES)
    if n_tiles % 2:                              # v7x megacore: even split
        n_tiles += 1
    return _MAX_BLOCK_SUBLANES, n_tiles


def _lnet_pallas(packed_params, x_fm, s_sub, n_tiles):
    return pl.pallas_call(
        _lnet_kernel,
        grid=(n_tiles,),
        in_specs=[
            # all 88 scalars in one SMEM operand (read as scalars in-kernel)
            pl.BlockSpec(memory_space=pltpu.MemorySpace.SMEM),
            pl.BlockSpec((3, s_sub, LANES), lambda i: (0, i, 0)),
        ],
        out_specs=pl.BlockSpec((3, s_sub, LANES), lambda i: (0, i, 0)),
        out_shape=jax.ShapeDtypeStruct((3, n_tiles * s_sub, LANES), jnp.float32),
        compiler_params=pltpu.CompilerParams(
            dimension_semantics=("parallel",),
            vmem_limit_bytes=32 * 1024 * 1024),
    )(packed_params, x_fm)


@jax.jit
def l_net_forward_packed(x1, x2, packed_params):
    """Fast path: returns the fused (3, B) output [out ; u ; out2]."""
    B = x1.shape[0]
    assert x1.shape == (B, 2) and x2.shape == (B, 1)
    s_sub, n_tiles = _choose_tiling(B)
    Bp = n_tiles * s_sub * LANES

    # Single fused feature-major repack (concat of transposed views) instead of
    # separate concat + transpose HBM passes.
    x_fm = jnp.concatenate([x1.T, x2.T], axis=0).astype(jnp.float32)   # (3, B)
    if Bp != B:
        x_fm = jnp.pad(x_fm, ((0, 0), (0, Bp - B)))
    x_fm = x_fm.reshape(3, Bp // LANES, LANES)

    packed_out = _lnet_pallas(packed_params, x_fm, s_sub, n_tiles)
    return packed_out.reshape(3, Bp)[:, :B]   # (3, B)


@jax.jit
def l_net_forward(x1, x2, packed_params):
    """PyTorch-compatible API: returns (out, u, out2), each (B, 1)."""
    B = x1.shape[0]
    y = l_net_forward_packed(x1, x2, packed_params)
    return (y[0].reshape(B, 1), y[1].reshape(B, 1), y[2].reshape(B, 1))


def init_params(key):
    """Deterministic init matching the shapes of L_Net.__init__ (PyTorch-style
    uniform(-1/sqrt(fan_in), 1/sqrt(fan_in)))."""
    def linear(key, out_f, in_f, bias=True):
        k_w, k_b = jax.random.split(key)
        bound = 1.0 / jnp.sqrt(in_f)
        w = jax.random.uniform(k_w, (out_f, in_f), jnp.float32, -bound, bound)
        if bias:
            b = jax.random.uniform(k_b, (out_f,), jnp.float32, -bound, bound)
            return w, b
        return w, None

    k1, k2, k3, k4, k5 = jax.random.split(key, 5)
    w1, b1 = linear(k1, 6, 2)
    w2, b2 = linear(k2, 1, 6)
    wc, _ = linear(k3, 1, 2, bias=False)
    w3, b3 = linear(k4, 12, 3)
    w4, b4 = linear(k5, 1, 12)
    return dict(w1=w1, b1=b1, w2=w2, b2=b2, wc=wc, w3=w3, b3=b3, w4=w4, b4=b4)


def l_net_reference(x1, x2, p):
    """Pure-JAX reference of the PyTorch forward, for correctness check."""
    h1 = jnp.tanh(x1 @ p["w1"].T + p["b1"])
    out = jnp.tanh(h1 @ p["w2"].T + p["b2"])
    u = x1 @ p["wc"].T
    combined = jnp.concatenate((x1, x2), axis=1)
    h2 = jnp.tanh(combined @ p["w3"].T + p["b3"])
    out2 = jnp.tanh(h2 @ p["w4"].T + p["b4"])
    return out, u, out2


if __name__ == "__main__":
    key = jax.random.PRNGKey(0)
    k_p, k_x1, k_x2 = jax.random.split(key, 3)

    params = init_params(k_p)
    packed = pack_params(params)  # hoisted out of the forward pass (one-time)

    # Main check: one dense tile (B = 2048 -> (3, 16, 128) block).
    B = 2048
    x1 = jax.random.normal(k_x1, (B, 2), jnp.float32)
    x2 = jax.random.normal(k_x2, (B, 1), jnp.float32)
    out, u, out2 = jax.block_until_ready(l_net_forward(x1, x2, packed))
    ref_out, ref_u, ref_out2 = l_net_reference(x1, x2, params)
    assert out.shape == (B, 1) and u.shape == (B, 1) and out2.shape == (B, 1)
    assert jnp.allclose(out, ref_out, atol=1e-5)
    assert jnp.allclose(u, ref_u, atol=1e-5)
    assert jnp.allclose(out2, ref_out2, atol=1e-5)

    # Secondary check: ragged batch exercising the padding path.
    B2 = 300
    x1b = jax.random.normal(jax.random.fold_in(k_x1, 1), (B2, 2), jnp.float32)
    x2b = jax.random.normal(jax.random.fold_in(k_x2, 1), (B2, 1), jnp.float32)
    ob, ub, o2b = jax.block_until_ready(l_net_forward(x1b, x2b, packed))
    rb, rub, r2b = l_net_reference(x1b, x2b, params)
    assert jnp.allclose(ob, rb, atol=1e-5)
    assert jnp.allclose(ub, rub, atol=1e-5)
    assert jnp.allclose(o2b, r2b, atol=1e-5)

    print("KERNEL_OK")
</pallas_src>

<mosaic_0001>
module attributes {stable_mosaic.version = 11 : i64} {
  func.func @_lnet_kernel(%arg0: i32, %arg1: memref<88xf32, #tpu.memory_space<smem>>, %arg2: memref<3x16x128xf32, #tpu.memory_space<vmem>>, %arg3: memref<3x16x128xf32, #tpu.memory_space<vmem>>) attributes {dimension_semantics = [#tpu.dimension_semantics<parallel>], iteration_bounds = array<i64: 1>, scalar_prefetch = 0 : i64, scratch_operands = 0 : i64, tpu.core_type = #tpu.core_type<tc>, window_params = [{transform_indices = @transform_0, window_bounds = array<i64: 88>}, {transform_indices = @transform_1, window_bounds = array<i64: 3, 16, 128>}, {transform_indices = @transform_2, window_bounds = array<i64: 3, 16, 128>}]} {
    %c0 = arith.constant 0 : index
    %c0_0 = arith.constant 0 : index
    %c0_1 = arith.constant 0 : index
    %0 = vector.load %arg2[%c0, %c0_0, %c0_1] : memref<3x16x128xf32, #tpu.memory_space<vmem>>, vector<1x16x128xf32>
    %1 = vector.shape_cast %0 : vector<1x16x128xf32> to vector<16x128xf32>
    %c1 = arith.constant 1 : index
    %c0_2 = arith.constant 0 : index
    %c0_3 = arith.constant 0 : index
    %2 = vector.load %arg2[%c1, %c0_2, %c0_3] : memref<3x16x128xf32, #tpu.memory_space<vmem>>, vector<1x16x128xf32>
    %3 = vector.shape_cast %2 : vector<1x16x128xf32> to vector<16x128xf32>
    %c2 = arith.constant 2 : index
    %c0_4 = arith.constant 0 : index
    %c0_5 = arith.constant 0 : index
    %4 = vector.load %arg2[%c2, %c0_4, %c0_5] : memref<3x16x128xf32, #tpu.memory_space<vmem>>, vector<1x16x128xf32>
    %5 = vector.shape_cast %4 : vector<1x16x128xf32> to vector<16x128xf32>
    %c25 = arith.constant 25 : index
    %6 = memref.load %arg1[%c25] : memref<88xf32, #tpu.memory_space<smem>>
    %7 = vector.broadcast %6 : f32 to vector<16x128xf32>
    %8 = arith.mulf %7, %1 : vector<16x128xf32>
    %c26 = arith.constant 26 : index
    %9 = memref.load %arg1[%c26] : memref<88xf32, #tpu.memory_space<smem>>
    %10 = vector.broadcast %9 : f32 to vector<16x128xf32>
    %11 = arith.mulf %10, %3 : vector<16x128xf32>
    %12 = arith.addf %8, %11 : vector<16x128xf32>
    %c1_6 = arith.constant 1 : index
    %c0_7 = arith.constant 0 : index
    %c0_8 = arith.constant 0 : index
    %13 = vector.load %arg3[%c1_6, %c0_7, %c0_8] : memref<3x16x128xf32, #tpu.memory_space<vmem>>, vector<1x16x128xf32>
    %14 = vector.shape_cast %13 : vector<1x16x128xf32> to vector<16x128xf32>
    %15 = vector.shape_cast %12 : vector<16x128xf32> to vector<1x16x128xf32>
    tpu.vector_store %arg3[%c1_6, %c0_7, %c0_8], %15 {strides = array<i32>} : memref<3x16x128xf32, #tpu.memory_space<vmem>>, vector<1x16x128xf32>,
    %c12 = arith.constant 12 : index
    %16 = memref.load %arg1[%c12] : memref<88xf32, #tpu.memory_space<smem>>
    %c0_9 = arith.constant 0 : index
    %17 = memref.load %arg1[%c0_9] : memref<88xf32, #tpu.memory_space<smem>>
    %18 = vector.broadcast %17 : f32 to vector<16x128xf32>
    %19 = arith.mulf %18, %1 : vector<16x128xf32>
    %20 = vector.broadcast %16 : f32 to vector<16x128xf32>
    %21 = arith.addf %20, %19 : vector<16x128xf32>
    %c1_10 = arith.constant 1 : index
    %22 = memref.load %arg1[%c1_10] : memref<88xf32, #tpu.memory_space<smem>>
    %23 = vector.broadcast %22 : f32 to vector<16x128xf32>
    %24 = arith.mulf %23, %3 : vector<16x128xf32>
    %25 = arith.addf %21, %24 : vector<16x128xf32>
    %26 = math.tanh %25 : vector<16x128xf32>
    %c18 = arith.constant 18 : index
    %27 = memref.load %arg1[%c18] : memref<88xf32, #tpu.memory_space<smem>>
    %28 = vector.broadcast %27 : f32 to vector<16x128xf32>
    %29 = arith.mulf %28, %26 : vector<16x128xf32>
    %c13 = arith.constant 13 : index
    %30 = memref.load %arg1[%c13] : memref<88xf32, #tpu.memory_space<smem>>
    %c2_11 = arith.constant 2 : index
    %31 = memref.load %arg1[%c2_11] : memref<88xf32, #tpu.memory_space<smem>>
    %32 = vector.broadcast %31 : f32 to vector<16x128xf32>
    %33 = arith.mulf %32, %1 : vector<16x128xf32>
    %34 = vector.broadcast %30 : f32 to vector<16x128xf32>
    %35 = arith.addf %34, %33 : vector<16x128xf32>
    %c3 = arith.constant 3 : index
    %36 = memref.load %arg1[%c3] : memref<88xf32, #tpu.memory_space<smem>>
    %37 = vector.broadcast %36 : f32 to vector<16x128xf32>
    %38 = arith.mulf %37, %3 : vector<16x128xf32>
    %39 = arith.addf %35, %38 : vector<16x128xf32>
    %40 = math.tanh %39 : vector<16x128xf32>
    %c19 = arith.constant 19 : index
    %41 = memref.load %arg1[%c19] : memref<88xf32, #tpu.memory_space<smem>>
    %42 = vector.broadcast %41 : f32 to vector<16x128xf32>
    %43 = arith.mulf %42, %40 : vector<16x128xf32>
    %c14 = arith.constant 14 : index
    %44 = memref.load %arg1[%c14] : memref<88xf32, #tpu.memory_space<smem>>
    %c4 = arith.constant 4 : index
    %45 = memref.load %arg1[%c4] : memref<88xf32, #tpu.memory_space<smem>>
    %46 = vector.broadcast %45 : f32 to vector<16x128xf32>
    %47 = arith.mulf %46, %1 : vector<16x128xf32>
    %48 = vector.broadcast %44 : f32 to vector<16x128xf32>
    %49 = arith.addf %48, %47 : vector<16x128xf32>
    %c5 = arith.constant 5 : index
    %50 = memref.load %arg1[%c5] : memref<88xf32, #tpu.memory_space<smem>>
    %51 = vector.broadcast %50 : f32 to vector<16x128xf32>
    %52 = arith.mulf %51, %3 : vector<16x128xf32>
    %53 = arith.addf %49, %52 : vector<16x128xf32>
    %54 = math.tanh %53 : vector<16x128xf32>
    %c20 = arith.constant 20 : index
    %55 = memref.load %arg1[%c20] : memref<88xf32, #tpu.memory_space<smem>>
    %56 = vector.broadcast %55 : f32 to vector<16x128xf32>
    %57 = arith.mulf %56, %54 : vector<16x128xf32>
    %c15 = arith.constant 15 : index
    %58 = memref.load %arg1[%c15] : memref<88xf32, #tpu.memory_space<smem>>
    %c6 = arith.constant 6 : index
    %59 = memref.load %arg1[%c6] : memref<88xf32, #tpu.memory_space<smem>>
    %60 = vector.broadcast %59 : f32 to vector<16x128xf32>
    %61 = arith.mulf %60, %1 : vector<16x128xf32>
    %62 = vector.broadcast %58 : f32 to vector<16x128xf32>
    %63 = arith.addf %62, %61 : vector<16x128xf32>
    %c7 = arith.constant 7 : index
    %64 = memref.load %arg1[%c7] : memref<88xf32, #tpu.memory_space<smem>>
    %65 = vector.broadcast %64 : f32 to vector<16x128xf32>
    %66 = arith.mulf %65, %3 : vector<16x128xf32>
    %67 = arith.addf %63, %66 : vector<16x128xf32>
    %68 = math.tanh %67 : vector<16x128xf32>
    %c21 = arith.constant 21 : index
    %69 = memref.load %arg1[%c21] : memref<88xf32, #tpu.memory_space<smem>>
    %70 = vector.broadcast %69 : f32 to vector<16x128xf32>
    %71 = arith.mulf %70, %68 : vector<16x128xf32>
    %c16 = arith.constant 16 : index
    %72 = memref.load %arg1[%c16] : memref<88xf32, #tpu.memory_space<smem>>
    %c8 = arith.constant 8 : index
    %73 = memref.load %arg1[%c8] : memref<88xf32, #tpu.memory_space<smem>>
    %74 = vector.broadcast %73 : f32 to vector<16x128xf32>
    %75 = arith.mulf %74, %1 : vector<16x128xf32>
    %76 = vector.broadcast %72 : f32 to vector<16x128xf32>
    %77 = arith.addf %76, %75 : vector<16x128xf32>
    %c9 = arith.constant 9 : index
    %78 = memref.load %arg1[%c9] : memref<88xf32, #tpu.memory_space<smem>>
    %79 = vector.broadcast %78 : f32 to vector<16x128xf32>
    %80 = arith.mulf %79, %3 : vector<16x128xf32>
    %81 = arith.addf %77, %80 : vector<16x128xf32>
    %82 = math.tanh %81 : vector<16x128xf32>
    %c22 = arith.constant 22 : index
    %83 = memref.load %arg1[%c22] : memref<88xf32, #tpu.memory_space<smem>>
    %84 = vector.broadcast %83 : f32 to vector<16x128xf32>
    %85 = arith.mulf %84, %82 : vector<16x128xf32>
    %c17 = arith.constant 17 : index
    %86 = memref.load %arg1[%c17] : memref<88xf32, #tpu.memory_space<smem>>
    %c10 = arith.constant 10 : index
    %87 = memref.load %arg1[%c10] : memref<88xf32, #tpu.memory_space<smem>>
    %88 = vector.broadcast %87 : f32 to vector<16x128xf32>
    %89 = arith.mulf %88, %1 : vector<16x128xf32>
    %90 = vector.broadcast %86 : f32 to vector<16x128xf32>
    %91 = arith.addf %90, %89 : vector<16x128xf32>
    %c11 = arith.constant 11 : index
    %92 = memref.load %arg1[%c11] : memref<88xf32, #tpu.memory_space<smem>>
    %93 = vector.broadcast %92 : f32 to vector<16x128xf32>
    %94 = arith.mulf %93, %3 : vector<16x128xf32>
    %95 = arith.addf %91, %94 : vector<16x128xf32>
    %96 = math.tanh %95 : vector<16x128xf32>
    %c23 = arith.constant 23 : index
    %97 = memref.load %arg1[%c23] : memref<88xf32, #tpu.memory_space<smem>>
    %98 = vector.broadcast %97 : f32 to vector<16x128xf32>
    %99 = arith.mulf %98, %96 : vector<16x128xf32>
    %100 = arith.addf %29, %43 : vector<16x128xf32>
    %101 = arith.addf %57, %71 : vector<16x128xf32>
    %102 = arith.addf %85, %99 : vector<16x128xf32>
    %103 = arith.addf %100, %101 : vector<16x128xf32>
    %104 = arith.addf %103, %102 : vector<16x128xf32>
    %c24 = arith.constant 24 : index
    %105 = memref.load %arg1[%c24] : memref<88xf32, #tpu.memory_space<smem>>
    %106 = vector.broadcast %105 : f32 to vector<16x128xf32>
    %107 = arith.addf %104, %106 : vector<16x128xf32>
    %108 = math.tanh %107 : vector<16x128xf32>
    %c0_12 = arith.constant 0 : index
    %c0_13 = arith.constant 0 : index
    %c0_14 = arith.constant 0 : index
    %109 = vector.load %arg3[%c0_12, %c0_13, %c0_14] : memref<3x16x128xf32, #tpu.memory_space<vmem>>, vector<1x16x128xf32>
    %110 = vector.shape_cast %109 : vector<1x16x128xf32> to vector<16x128xf32>
    %111 = vector.shape_cast %108 : vector<16x128xf32> to vector<1x16x128xf32>
    tpu.vector_store %arg3[%c0_12, %c0_13, %c0_14], %111 {strides = array<i32>} : memref<3x16x128xf32, #tpu.memory_space<vmem>>, vector<1x16x128xf32>,
    %c63 = arith.constant 63 : index
    %112 = memref.load %arg1[%c63] : memref<88xf32, #tpu.memory_space<smem>>
    %c27 = arith.constant 27 : index
    %113 = memref.load %arg1[%c27] : memref<88xf32, #tpu.memory_space<smem>>
    %114 = vector.broadcast %113 : f32 to vector<16x128xf32>
    %115 = arith.mulf %114, %1 : vector<16x128xf32>
    %116 = vector.broadcast %112 : f32 to vector<16x128xf32>
    %117 = arith.addf %116, %115 : vector<16x128xf32>
    %c28 = arith.constant 28 : index
    %118 = memref.load %arg1[%c28] : memref<88xf32, #tpu.memory_space<smem>>
    %119 = vector.broadcast %118 : f32 to vector<16x128xf32>
    %120 = arith.mulf %119, %3 : vector<16x128xf32>
    %121 = arith.addf %117, %120 : vector<16x128xf32>
    %c29 = arith.constant 29 : index
    %122 = memref.load %arg1[%c29] : memref<88xf32, #tpu.memory_space<smem>>
    %123 = vector.broadcast %122 : f32 to vector<16x128xf32>
    %124 = arith.mulf %123, %5 : vector<16x128xf32>
    %125 = arith.addf %121, %124 : vector<16x128xf32>
    %126 = math.tanh %125 : vector<16x128xf32>
    %c75 = arith.constant 75 : index
    %127 = memref.load %arg1[%c75] : memref<88xf32, #tpu.memory_space<smem>>
    %128 = vector.broadcast %127 : f32 to vector<16x128xf32>
    %129 = arith.mulf %128, %126 : vector<16x128xf32>
    %c64 = arith.constant 64 : index
    %130 = memref.load %arg1[%c64] : memref<88xf32, #tpu.memory_space<smem>>
    %c30 = arith.constant 30 : index
    %131 = memref.load %arg1[%c30] : memref<88xf32, #tpu.memory_space<smem>>
    %132 = vector.broadcast %131 : f32 to vector<16x128xf32>
    %133 = arith.mulf %132, %1 : vector<16x128xf32>
    %134 = vector.broadcast %130 : f32 to vector<16x128xf32>
    %135 = arith.addf %134, %133 : vector<16x128xf32>
    %c31 = arith.constant 31 : index
    %136 = memref.load %arg1[%c31] : memref<88xf32, #tpu.memory_space<smem>>
    %137 = vector.broadcast %136 : f32 to vector<16x128xf32>
    %138 = arith.mulf %137, %3 : vector<16x128xf32>
    %139 = arith.addf %135, %138 : vector<16x128xf32>
    %c32 = arith.constant 32 : index
    %140 = memref.load %arg1[%c32] : memref<88xf32, #tpu.memory_space<smem>>
    %141 = vector.broadcast %140 : f32 to vector<16x128xf32>
    %142 = arith.mulf %141, %5 : vector<16x128xf32>
    %143 = arith.addf %139, %142 : vector<16x128xf32>
    %144 = math.tanh %143 : vector<16x128xf32>
    %c76 = arith.constant 76 : index
    %145 = memref.load %arg1[%c76] : memref<88xf32, #tpu.memory_space<smem>>
    %146 = vector.broadcast %145 : f32 to vector<16x128xf32>
    %147 = arith.mulf %146, %144 : vector<16x128xf32>
    %c65 = arith.constant 65 : index
    %148 = memref.load %arg1[%c65] : memref<88xf32, #tpu.memory_space<smem>>
    %c33 = arith.constant 33 : index
    %149 = memref.load %arg1[%c33] : memref<88xf32, #tpu.memory_space<smem>>
    %150 = vector.broadcast %149 : f32 to vector<16x128xf32>
    %151 = arith.mulf %150, %1 : vector<16x128xf32>
    %152 = vector.broadcast %148 : f32 to vector<16x128xf32>
    %153 = arith.addf %152, %151 : vector<16x128xf32>
    %c34 = arith.constant 34 : index
    %154 = memref.load %arg1[%c34] : memref<88xf32, #tpu.memory_space<smem>>
    %155 = vector.broadcast %154 : f32 to vector<16x128xf32>
    %156 = arith.mulf %155, %3 : vector<16x128xf32>
    %157 = arith.addf %153, %156 : vector<16x128xf32>
    %c35 = arith.constant 35 : index
    %158 = memref.load %arg1[%c35] : memref<88xf32, #tpu.memory_space<smem>>
    %159 = vector.broadcast %158 : f32 to vector<16x128xf32>
    %160 = arith.mulf %159, %5 : vector<16x128xf32>
    %161 = arith.addf %157, %160 : vector<16x128xf32>
    %162 = math.tanh %161 : vector<16x128xf32>
    %c77 = arith.constant 77 : index
    %163 = memref.load %arg1[%c77] : memref<88xf32, #tpu.memory_space<smem>>
    %164 = vector.broadcast %163 : f32 to vector<16x128xf32>
    %165 = arith.mulf %164, %162 : vector<16x128xf32>
    %c66 = arith.constant 66 : index
    %166 = memref.load %arg1[%c66] : memref<88xf32, #tpu.memory_space<smem>>
    %c36 = arith.constant 36 : index
    %167 = memref.load %arg1[%c36] : memref<88xf32, #tpu.memory_space<smem>>
    %168 = vector.broadcast %167 : f32 to vector<16x128xf32>
    %169 = arith.mulf %168, %1 : vector<16x128xf32>
    %170 = vector.broadcast %166 : f32 to vector<16x128xf32>
    %171 = arith.addf %170, %169 : vector<16x128xf32>
    %c37 = arith.constant 37 : index
    %172 = memref.load %arg1[%c37] : memref<88xf32, #tpu.memory_space<smem>>
    %173 = vector.broadcast %172 : f32 to vector<16x128xf32>
    %174 = arith.mulf %173, %3 : vector<16x128xf32>
    %175 = arith.addf %171, %174 : vector<16x128xf32>
    %c38 = arith.constant 38 : index
    %176 = memref.load %arg1[%c38] : memref<88xf32, #tpu.memory_space<smem>>
    %177 = vector.broadcast %176 : f32 to vector<16x128xf32>
    %178 = arith.mulf %177, %5 : vector<16x128xf32>
    %179 = arith.addf %175, %178 : vector<16x128xf32>
    %180 = math.tanh %179 : vector<16x128xf32>
    %c78 = arith.constant 78 : index
    %181 = memref.load %arg1[%c78] : memref<88xf32, #tpu.memory_space<smem>>
    %182 = vector.broadcast %181 : f32 to vector<16x128xf32>
    %183 = arith.mulf %182, %180 : vector<16x128xf32>
    %c67 = arith.constant 67 : index
    %184 = memref.load %arg1[%c67] : memref<88xf32, #tpu.memory_space<smem>>
    %c39 = arith.constant 39 : index
    %185 = memref.load %arg1[%c39] : memref<88xf32, #tpu.memory_space<smem>>
    %186 = vector.broadcast %185 : f32 to vector<16x128xf32>
    %187 = arith.mulf %186, %1 : vector<16x128xf32>
    %188 = vector.broadcast %184 : f32 to vector<16x128xf32>
    %189 = arith.addf %188, %187 : vector<16x128xf32>
    %c40 = arith.constant 40 : index
    %190 = memref.load %arg1[%c40] : memref<88xf32, #tpu.memory_space<smem>>
    %191 = vector.broadcast %190 : f32 to vector<16x128xf32>
    %192 = arith.mulf %191, %3 : vector<16x128xf32>
    %193 = arith.addf %189, %192 : vector<16x128xf32>
    %c41 = arith.constant 41 : index
    %194 = memref.load %arg1[%c41] : memref<88xf32, #tpu.memory_space<smem>>
    %195 = vector.broadcast %194 : f32 to vector<16x128xf32>
    %196 = arith.mulf %195, %5 : vector<16x128xf32>
    %197 = arith.addf %193, %196 : vector<16x128xf32>
    %198 = math.tanh %197 : vector<16x128xf32>
    %c79 = arith.constant 79 : index
    %199 = memref.load %arg1[%c79] : memref<88xf32, #tpu.memory_space<smem>>
    %200 = vector.broadcast %199 : f32 to vector<16x128xf32>
    %201 = arith.mulf %200, %198 : vector<16x128xf32>
    %c68 = arith.constant 68 : index
    %202 = memref.load %arg1[%c68] : memref<88xf32, #tpu.memory_space<smem>>
    %c42 = arith.constant 42 : index
    %203 = memref.load %arg1[%c42] : memref<88xf32, #tpu.memory_space<smem>>
    %204 = vector.broadcast %203 : f32 to vector<16x128xf32>
    %205 = arith.mulf %204, %1 : vector<16x128xf32>
    %206 = vector.broadcast %202 : f32 to vector<16x128xf32>
    %207 = arith.addf %206, %205 : vector<16x128xf32>
    %c43 = arith.constant 43 : index
    %208 = memref.load %arg1[%c43] : memref<88xf32, #tpu.memory_space<smem>>
    %209 = vector.broadcast %208 : f32 to vector<16x128xf32>
    %210 = arith.mulf %209, %3 : vector<16x128xf32>
    %211 = arith.addf %207, %210 : vector<16x128xf32>
    %c44 = arith.constant 44 : index
    %212 = memref.load %arg1[%c44] : memref<88xf32, #tpu.memory_space<smem>>
    %213 = vector.broadcast %212 : f32 to vector<16x128xf32>
    %214 = arith.mulf %213, %5 : vector<16x128xf32>
    %215 = arith.addf %211, %214 : vector<16x128xf32>
    %216 = math.tanh %215 : vector<16x128xf32>
    %c80 = arith.constant 80 : index
    %217 = memref.load %arg1[%c80] : memref<88xf32, #tpu.memory_space<smem>>
    %218 = vector.broadcast %217 : f32 to vector<16x128xf32>
    %219 = arith.mulf %218, %216 : vector<16x128xf32>
    %c69 = arith.constant 69 : index
    %220 = memref.load %arg1[%c69] : memref<88xf32, #tpu.memory_space<smem>>
    %c45 = arith.constant 45 : index
    %221 = memref.load %arg1[%c45] : memref<88xf32, #tpu.memory_space<smem>>
    %222 = vector.broadcast %221 : f32 to vector<16x128xf32>
    %223 = arith.mulf %222, %1 : vector<16x128xf32>
    %224 = vector.broadcast %220 : f32 to vector<16x128xf32>
    %225 = arith.addf %224, %223 : vector<16x128xf32>
    %c46 = arith.constant 46 : index
    %226 = memref.load %arg1[%c46] : memref<88xf32, #tpu.memory_space<smem>>
    %227 = vector.broadcast %226 : f32 to vector<16x128xf32>
    %228 = arith.mulf %227, %3 : vector<16x128xf32>
    %229 = arith.addf %225, %228 : vector<16x128xf32>
    %c47 = arith.constant 47 : index
    %230 = memref.load %arg1[%c47] : memref<88xf32, #tpu.memory_space<smem>>
    %231 = vector.broadcast %230 : f32 to vector<16x128xf32>
    %232 = arith.mulf %231, %5 : vector<16x128xf32>
    %233 = arith.addf %229, %232 : vector<16x128xf32>
    %234 = math.tanh %233 : vector<16x128xf32>
    %c81 = arith.constant 81 : index
    %235 = memref.load %arg1[%c81] : memref<88xf32, #tpu.memory_space<smem>>
    %236 = vector.broadcast %235 : f32 to vector<16x128xf32>
    %237 = arith.mulf %236, %234 : vector<16x128xf32>
    %c70 = arith.constant 70 : index
    %238 = memref.load %arg1[%c70] : memref<88xf32, #tpu.memory_space<smem>>
    %c48 = arith.constant 48 : index
    %239 = memref.load %arg1[%c48] : memref<88xf32, #tpu.memory_space<smem>>
    %240 = vector.broadcast %239 : f32 to vector<16x128xf32>
    %241 = arith.mulf %240, %1 : vector<16x128xf32>
    %242 = vector.broadcast %238 : f32 to vector<16x128xf32>
    %243 = arith.addf %242, %241 : vector<16x128xf32>
    %c49 = arith.constant 49 : index
    %244 = memref.load %arg1[%c49] : memref<88xf32, #tpu.memory_space<smem>>
    %245 = vector.broadcast %244 : f32 to vector<16x128xf32>
    %246 = arith.mulf %245, %3 : vector<16x128xf32>
    %247 = arith.addf %243, %246 : vector<16x128xf32>
    %c50 = arith.constant 50 : index
    %248 = memref.load %arg1[%c50] : memref<88xf32, #tpu.memory_space<smem>>
    %249 = vector.broadcast %248 : f32 to vector<16x128xf32>
    %250 = arith.mulf %249, %5 : vector<16x128xf32>
    %251 = arith.addf %247, %250 : vector<16x128xf32>
    %252 = math.tanh %251 : vector<16x128xf32>
    %c82 = arith.constant 82 : index
    %253 = memref.load %arg1[%c82] : memref<88xf32, #tpu.memory_space<smem>>
    %254 = vector.broadcast %253 : f32 to vector<16x128xf32>
    %255 = arith.mulf %254, %252 : vector<16x128xf32>
    %c71 = arith.constant 71 : index
    %256 = memref.load %arg1[%c71] : memref<88xf32, #tpu.memory_space<smem>>
    %c51 = arith.constant 51 : index
    %257 = memref.load %arg1[%c51] : memref<88xf32, #tpu.memory_space<smem>>
    %258 = vector.broadcast %257 : f32 to vector<16x128xf32>
    %259 = arith.mulf %258, %1 : vector<16x128xf32>
    %260 = vector.broadcast %256 : f32 to vector<16x128xf32>
    %261 = arith.addf %260, %259 : vector<16x128xf32>
    %c52 = arith.constant 52 : index
    %262 = memref.load %arg1[%c52] : memref<88xf32, #tpu.memory_space<smem>>
    %263 = vector.broadcast %262 : f32 to vector<16x128xf32>
    %264 = arith.mulf %263, %3 : vector<16x128xf32>
    %265 = arith.addf %261, %264 : vector<16x128xf32>
    %c53 = arith.constant 53 : index
    %266 = memref.load %arg1[%c53] : memref<88xf32, #tpu.memory_space<smem>>
    %267 = vector.broadcast %266 : f32 to vector<16x128xf32>
    %268 = arith.mulf %267, %5 : vector<16x128xf32>
    %269 = arith.addf %265, %268 : vector<16x128xf32>
    %270 = math.tanh %269 : vector<16x128xf32>
    %c83 = arith.constant 83 : index
    %271 = memref.load %arg1[%c83] : memref<88xf32, #tpu.memory_space<smem>>
    %272 = vector.broadcast %271 : f32 to vector<16x128xf32>
    %273 = arith.mulf %272, %270 : vector<16x128xf32>
    %c72 = arith.constant 72 : index
    %274 = memref.load %arg1[%c72] : memref<88xf32, #tpu.memory_space<smem>>
    %c54 = arith.constant 54 : index
    %275 = memref.load %arg1[%c54] : memref<88xf32, #tpu.memory_space<smem>>
    %276 = vector.broadcast %275 : f32 to vector<16x128xf32>
    %277 = arith.mulf %276, %1 : vector<16x128xf32>
    %278 = vector.broadcast %274 : f32 to vector<16x128xf32>
    %279 = arith.addf %278, %277 : vector<16x128xf32>
    %c55 = arith.constant 55 : index
    %280 = memref.load %arg1[%c55] : memref<88xf32, #tpu.memory_space<smem>>
    %281 = vector.broadcast %280 : f32 to vector<16x128xf32>
    %282 = arith.mulf %281, %3 : vector<16x128xf32>
    %283 = arith.addf %279, %282 : vector<16x128xf32>
    %c56 = arith.constant 56 : index
    %284 = memref.load %arg1[%c56] : memref<88xf32, #tpu.memory_space<smem>>
    %285 = vector.broadcast %284 : f32 to vector<16x128xf32>
    %286 = arith.mulf %285, %5 : vector<16x128xf32>
    %287 = arith.addf %283, %286 : vector<16x128xf32>
    %288 = math.tanh %287 : vector<16x128xf32>
    %c84 = arith.constant 84 : index
    %289 = memref.load %arg1[%c84] : memref<88xf32, #tpu.memory_space<smem>>
    %290 = vector.broadcast %289 : f32 to vector<16x128xf32>
    %291 = arith.mulf %290, %288 : vector<16x128xf32>
    %c73 = arith.constant 73 : index
    %292 = memref.load %arg1[%c73] : memref<88xf32, #tpu.memory_space<smem>>
    %c57 = arith.constant 57 : index
    %293 = memref.load %arg1[%c57] : memref<88xf32, #tpu.memory_space<smem>>
    %294 = vector.broadcast %293 : f32 to vector<16x128xf32>
    %295 = arith.mulf %294, %1 : vector<16x128xf32>
    %296 = vector.broadcast %292 : f32 to vector<16x128xf32>
    %297 = arith.addf %296, %295 : vector<16x128xf32>
    %c58 = arith.constant 58 : index
    %298 = memref.load %arg1[%c58] : memref<88xf32, #tpu.memory_space<smem>>
    %299 = vector.broadcast %298 : f32 to vector<16x128xf32>
    %300 = arith.mulf %299, %3 : vector<16x128xf32>
    %301 = arith.addf %297, %300 : vector<16x128xf32>
    %c59 = arith.constant 59 : index
    %302 = memref.load %arg1[%c59] : memref<88xf32, #tpu.memory_space<smem>>
    %303 = vector.broadcast %302 : f32 to vector<16x128xf32>
    %304 = arith.mulf %303, %5 : vector<16x128xf32>
    %305 = arith.addf %301, %304 : vector<16x128xf32>
    %306 = math.tanh %305 : vector<16x128xf32>
    %c85 = arith.constant 85 : index
    %307 = memref.load %arg1[%c85] : memref<88xf32, #tpu.memory_space<smem>>
    %308 = vector.broadcast %307 : f32 to vector<16x128xf32>
    %309 = arith.mulf %308, %306 : vector<16x128xf32>
    %c74 = arith.constant 74 : index
    %310 = memref.load %arg1[%c74] : memref<88xf32, #tpu.memory_space<smem>>
    %c60 = arith.constant 60 : index
    %311 = memref.load %arg1[%c60] : memref<88xf32, #tpu.memory_space<smem>>
    %312 = vector.broadcast %311 : f32 to vector<16x128xf32>
    %313 = arith.mulf %312, %1 : vector<16x128xf32>
    %314 = vector.broadcast %310 : f32 to vector<16x128xf32>
    %315 = arith.addf %314, %313 : vector<16x128xf32>
    %c61 = arith.constant 61 : index
    %316 = memref.load %arg1[%c61] : memref<88xf32, #tpu.memory_space<smem>>
    %317 = vector.broadcast %316 : f32 to vector<16x128xf32>
    %318 = arith.mulf %317, %3 : vector<16x128xf32>
    %319 = arith.addf %315, %318 : vector<16x128xf32>
    %c62 = arith.constant 62 : index
    %320 = memref.load %arg1[%c62] : memref<88xf32, #tpu.memory_space<smem>>
    %321 = vector.broadcast %320 : f32 to vector<16x128xf32>
    %322 = arith.mulf %321, %5 : vector<16x128xf32>
    %323 = arith.addf %319, %322 : vector<16x128xf32>
    %324 = math.tanh %323 : vector<16x128xf32>
    %c86 = arith.constant 86 : index
    %325 = memref.load %arg1[%c86] : memref<88xf32, #tpu.memory_space<smem>>
    %326 = vector.broadcast %325 : f32 to vector<16x128xf32>
    %327 = arith.mulf %326, %324 : vector<16x128xf32>
    %328 = arith.addf %129, %147 : vector<16x128xf32>
    %329 = arith.addf %165, %183 : vector<16x128xf32>
    %330 = arith.addf %201, %219 : vector<16x128xf32>
    %331 = arith.addf %237, %255 : vector<16x128xf32>
    %332 = arith.addf %273, %291 : vector<16x128xf32>
    %333 = arith.addf %309, %327 : vector<16x128xf32>
    %334 = arith.addf %328, %329 : vector<16x128xf32>
    %335 = arith.addf %330, %331 : vector<16x128xf32>
    %336 = arith.addf %332, %333 : vector<16x128xf32>
    %337 = arith.addf %334, %335 : vector<16x128xf32>
    %338 = arith.addf %337, %336 : vector<16x128xf32>
    %c87 = arith.constant 87 : index
    %339 = memref.load %arg1[%c87] : memref<88xf32, #tpu.memory_space<smem>>
    %340 = vector.broadcast %339 : f32 to vector<16x128xf32>
    %341 = arith.addf %338, %340 : vector<16x128xf32>
    %342 = math.tanh %341 : vector<16x128xf32>
    %c2_15 = arith.constant 2 : index
    %c0_16 = arith.constant 0 : index
    %c0_17 = arith.constant 0 : index
    %343 = vector.load %arg3[%c2_15, %c0_16, %c0_17] : memref<3x16x128xf32, #tpu.memory_space<vmem>>, vector<1x16x128xf32>
    %344 = vector.shape_cast %343 : vector<1x16x128xf32> to vector<16x128xf32>
    %345 = vector.shape_cast %342 : vector<16x128xf32> to vector<1x16x128xf32>
    tpu.vector_store %arg3[%c2_15, %c0_16, %c0_17], %345 {strides = array<i32>} : memref<3x16x128xf32, #tpu.memory_space<vmem>>, vector<1x16x128xf32>,
    return
  }
  func.func @transform_0(%arg0: i32) -> i32 {
    %c0_i32 = arith.constant 0 : i32
    %c0_i32_0 = arith.constant 0 : i32
    return %c0_i32 : i32
  }
  func.func @transform_1(%arg0: i32) -> (i32, i32, i32) {
    %c0_i32 = arith.constant 0 : i32
    %c0_i32_0 = arith.constant 0 : i32
    %c0_i32_1 = arith.constant 0 : i32
    return %c0_i32, %arg0, %c0_i32_0 : i32, i32, i32
  }
  func.func @transform_2(%arg0: i32) -> (i32, i32, i32) {
    %c0_i32 = arith.constant 0 : i32
    %c0_i32_0 = arith.constant 0 : i32
    %c0_i32_1 = arith.constant 0 : i32
    return %c0_i32, %arg0, %c0_i32_0 : i32, i32, i32
  }
}

</mosaic_0001>

<bundles_post_ra>
// kernel: l_net_forward_packed.1
= control target key start
LH: loop header
LB: loop body
LE: loop exit
PB: predicated region body
PF: predicated region fallthrough
CT: control target
= control target key end

     0   :  { %7 = vsyncpa [#allocation3], 0  ;;  %s721_s12 = smov [#allocation2]   ;;  %s1181_s0 = inlined_call_operand.vmem [shape: f32[88], index: 0, kind: input, shape index: {}]   ;;  %s1182_s1 = inlined_call_operand.vmem [shape: f32[3,16,128], index: 1, kind: input, shape index: {}]   ;;  %s1183_s2 = inlined_call_operand.vmem [shape: f32[3,16,128], index: 2, kind: output, shape index: {}]  }
   0x1   :  { %s13_s11 = sshll.u32 %s1181_s0, 4  ;;  %s14_s11 = int_to_ptr.vmem [resolvable:$true] %s13_s11 }
   0x2   :  { %16 = dma.vmem_to_smem %s14_s11, 16, %s721_s12, [#allocation3]  }
   0x3   :  { %719 = dma.done.wait [#allocation3], 16  }
   0x4   :  { %720 = vsyncadd [#allocation3], 4294967280 }
   0x5   :  { %23 = sfence }
   0x6   :  { %s535_s13 = sld [smem:[#allocation2 + $0x19]]  ;;  %v743_v0 = vld [vmem:[%s1182_s1] sm:$0xff]  ;;  %v748_v1 = vld [vmem:[%s1182_s1 + $0x8] sm:$0xff]  ;;  %v755_v3 = vld [vmem:[%s1182_s1 + $0x10] sm:$0xff] }
   0x7   :  { %s536_s14 = sld [smem:[#allocation2 + $0x1a]]  ;;  %v760_v4 = vld [vmem:[%s1182_s1 + $0x18] sm:$0xff] }
   0x8   :  { %s539_s15 = sld [smem:[#allocation2 + $0xc]] }
   0x9   :  { %s46_s16 = sld [smem:[#allocation2]] }
   0xa   :  { %s540_s17 = sld [smem:[#allocation2 + $0x1]] }
   0xb   :  { %s750_s0 = sld [smem:[#allocation2 + $0xd]] }
   0xc   :  { %v33_v2 = vstv %s535_s13  ;;  %s543_s26 = sld [smem:[#allocation2 + $0x2]] }
   0xd   :  { %v34_v5 = vmul.f32 %v33_v2, %v743_v0  ;;  %v35_v6 = vmul.f32 %v33_v2, %v748_v1  ;;  %v37_v7 = vstv %s536_s14  ;;  %s766_s27 = sld [smem:[#allocation2 + $0x3]] }
   0xe   :  { %v38_v8 = vmul.f32 %v755_v3, %v37_v7  ;;  %v39_v9 = vmul.f32 %v760_v4, %v37_v7  ;;  %v50_v11 = vstv %s539_s15  ;;  %s768_s28 = sld [smem:[#allocation2 + $0x12]] }
   0xf   :  { %v47_v10 = vstv %s46_s16  ;;  %s772_s29 = sld [smem:[#allocation2 + $0xe]] }
  0x10   :  { %v40_v12 = vadd.f32 %v38_v8, %v34_v5  ;;  %v41_v13 = vadd.f32 %v39_v9, %v35_v6  ;;  %v48_v14 = vmul.f32 %v47_v10, %v743_v0  ;;  %v49_v15 = vmul.f32 %v47_v10, %v748_v1  ;;  %s547_s30 = sld [smem:[#allocation2 + $0x4]] }
  0x11   :  { %v54_v16 = vstv %s540_s17  ;;  %s548_s5 = sld [smem:[#allocation2 + $0x5]]  ;;  %v70_v22 = vstv %s750_s0 }
  0x12   :  { %537 = vst [vmem:[%s1183_s2 + $0x10] sm:$0xff] %v40_v12  ;;  %v51_v17 = vadd.f32 %v50_v11, %v48_v14  ;;  %v52_v18 = vadd.f32 %v50_v11, %v49_v15  ;;  %v55_v19 = vmul.f32 %v755_v3, %v54_v16  ;;  %v56_v20 = vmul.f32 %v760_v4, %v54_v16  ;;  %s783_s8 = sld [smem:[#allocation2 + $0x13]] }
  0x13   :  { %538 = vst [vmem:[%s1183_s2 + $0x18] sm:$0xff] %v41_v13  ;;  %v67_v21 = vstv %s543_s26  ;;  %s787_s9 = sld [smem:[#allocation2 + $0xf]]  ;;  %v74_v26 = vstv %s766_s27 }
  0x14   :  { %v68_v23 = vmul.f32 %v67_v21, %v743_v0  ;;  %v69_v24 = vmul.f32 %v67_v21, %v748_v1  ;;  %v57_v25 = vadd.f32 %v55_v19, %v51_v17  ;;  %s790_s10 = sld [smem:[#allocation2 + $0x6]]  ;;  %v58_v27 = vadd.f32 %v56_v20, %v52_v18 }
  0x15   :  { %v75_v30 = vmul.f32 %v755_v3, %v74_v26  ;;  %s793_s11 = sld [smem:[#allocation2 + $0x7]]  ;;  %v76_v31 = vmul.f32 %v760_v4, %v74_v26  ;;  %v90_v33 = vstv %s772_s29  ;;  %v62_v49 = vstv %s768_s28 }
  0x16   :  { %v71_v28 = vadd.f32 %v70_v22, %v68_v23  ;;  %v72_v29 = vadd.f32 %v70_v22, %v69_v24  ;;  %v87_v32 = vstv %s547_s30  ;;  %s797_s12 = sld [smem:[#allocation2 + $0x14]]  ;;  %627 = vtanh.f32 %v57_v25 }
  0x17   :  { %v88_v35 = vmul.f32 %v87_v32, %v743_v0  ;;  %v89_v36 = vmul.f32 %v87_v32, %v748_v1  ;;  %v94_v37 = vstv %s548_s5  ;;  %s801_s13 = sld [smem:[#allocation2 + $0x10]]  ;;  %629 = vtanh.f32 %v58_v27 }
  0x18   :  { %v77_v34 = vadd.f32 %v75_v30, %v71_v28  ;;  %v78_v38 = vadd.f32 %v76_v31, %v72_v29  ;;  %v95_v39 = vmul.f32 %v755_v3, %v94_v37  ;;  %v96_v40 = vmul.f32 %v760_v4, %v94_v37  ;;  %s805_s14 = sld [smem:[#allocation2 + $0x8]] }
  0x19   :  { %v91_v41 = vadd.f32 %v90_v33, %v88_v35  ;;  %v92_v42 = vadd.f32 %v90_v33, %v89_v36  ;;  %s807_s15 = sld [smem:[#allocation2 + $0x9]]  ;;  %v110_v44 = vstv %s787_s9  ;;  %v82_v51 = vstv %s783_s8 }
  0x1a   :  { %631 = vtanh.f32 %v77_v34  ;;  %v107_v43 = vstv %s790_s10  ;;  %s811_s16 = sld [smem:[#allocation2 + $0x15]] }
  0x1b   :  { %v97_v45 = vadd.f32 %v95_v39, %v91_v41  ;;  %v98_v46 = vadd.f32 %v96_v40, %v92_v42  ;;  %v108_v47 = vmul.f32 %v107_v43, %v743_v0  ;;  %v109_v48 = vmul.f32 %v107_v43, %v748_v1  ;;  %s815_s17 = sld [smem:[#allocation2 + $0x11]] }
  0x1c   :  { %633 = vtanh.f32 %v78_v38  ;;  %v114_v50 = vstv %s793_s11  ;;  %s819_s18 = sld [smem:[#allocation2 + $0xa]]  ;;  %v628_v54 = vpop.eup %627  ;;  %v102_v2 = vstv %s797_s12 }
  0x1d   :  { %635 = vtanh.f32 %v97_v45  ;;  %v111_v52 = vadd.f32 %v110_v44, %v108_v47  ;;  %v112_v53 = vadd.f32 %v110_v44, %v109_v48  ;;  %s822_s19 = sld [smem:[#allocation2 + $0xb]]  ;;  %v115_v55 = vmul.f32 %v755_v3, %v114_v50  ;;  %v630_v58 = vpop.eup %629  ;;  %v873_v44 = vld [vmem:[%s1182_s1 + $0x20] sm:$0xff]  ;;  %v878_v45 = vld [vmem:[%s1182_s1 + $0x28] sm:$0xff] }
  0x1e   :  { %637 = vtanh.f32 %v98_v46  ;;  %v116_v56 = vmul.f32 %v760_v4, %v114_v50  ;;  %v127_v57 = vstv %s805_s14  ;;  %s827_s20 = sld [smem:[#allocation2 + $0x16]]  ;;  %v130_v61 = vstv %s801_s13 }
  0x1f   :  { %v128_v59 = vmul.f32 %v127_v57, %v743_v0  ;;  %v129_v60 = vmul.f32 %v127_v57, %v748_v1  ;;  %v134_v62 = vstv %s807_s15  ;;  %v117_v5 = vadd.f32 %v115_v55, %v111_v52  ;;  %s835_s21 = sld [smem:[#allocation2 + $0x3f]] }
  0x20   :  { %v632_v63 = vpop.eup %631  ;;  %v118_v6 = vadd.f32 %v116_v56, %v112_v53  ;;  %v135_v7 = vmul.f32 %v755_v3, %v134_v62  ;;  %v63_v8 = vmul.f32 %v628_v54, %v62_v49  ;;  %v136_v11 = vmul.f32 %v760_v4, %v134_v62  ;;  %s838_s0 = sld [smem:[#allocation2 + $0x1b]] }
  0x21   :  { %v131_v9 = vadd.f32 %v130_v61, %v128_v59  ;;  %v132_v10 = vadd.f32 %v130_v61, %v129_v60  ;;  %639 = vtanh.f32 %v117_v5  ;;  %v122_v13 = vstv %s811_s16  ;;  %s843_s22 = sld [smem:[#allocation2 + $0x1c]] }
  0x22   :  { %v634_v12 = vpop.eup %633  ;;  %v147_v14 = vstv %s819_s18  ;;  %v150_v15 = vstv %s815_s17  ;;  %641 = vtanh.f32 %v118_v6  ;;  %s846_s23 = sld [smem:[#allocation2 + $0x1d]]  ;;  %v64_v21 = vmul.f32 %v630_v58, %v62_v49 }
  0x23   :  { %v636_v16 = vpop.eup %635  ;;  %v137_v17 = vadd.f32 %v135_v7, %v131_v9  ;;  %v138_v18 = vadd.f32 %v136_v11, %v132_v10  ;;  %v148_v19 = vmul.f32 %v147_v14, %v743_v0  ;;  %v83_v22 = vmul.f32 %v632_v63, %v82_v51  ;;  %s850_s24 = sld [smem:[#allocation2 + $0x17]] }
  0x24   :  { %v638_v20 = vpop.eup %637  ;;  %v149_v23 = vmul.f32 %v147_v14, %v748_v1  ;;  %v154_v24 = vstv %s822_s19  ;;  %v84_v25 = vmul.f32 %v634_v12, %v82_v51  ;;  %s853_s25 = sld [smem:[#allocation2 + $0x40]]  ;;  %v142_v28 = vstv %s827_s20 }
  0x25   :  { %643 = vtanh.f32 %v137_v17  ;;  %v151_v26 = vadd.f32 %v150_v15, %v148_v19  ;;  %v155_v27 = vmul.f32 %v755_v3, %v154_v24  ;;  %v156_v30 = vmul.f32 %v760_v4, %v154_v24  ;;  %s857_s26 = sld [smem:[#allocation2 + $0x1e]] }
  0x26   :  { %645 = vtanh.f32 %v138_v18  ;;  %v152_v29 = vadd.f32 %v150_v15, %v149_v23  ;;  %v103_v31 = vmul.f32 %v636_v16, %v102_v2  ;;  %v104_v32 = vmul.f32 %v638_v20, %v102_v2  ;;  %s860_s27 = sld [smem:[#allocation2 + $0x1f]] }
  0x27   :  { %v157_v33 = vadd.f32 %v155_v27, %v151_v26  ;;  %v185_v34 = vstv %s838_s0  ;;  %v640_v35 = vpop.eup %639  ;;  %v188_v39 = vstv %s835_s21  ;;  %s865_s28 = sld [smem:[#allocation2 + $0x20]]  ;;  %v165_v42 = vadd.f32 %v83_v22, %v63_v8 }
  0x28   :  { %v158_v36 = vadd.f32 %v156_v30, %v152_v29  ;;  %v186_v37 = vmul.f32 %v185_v34, %v743_v0  ;;  %v187_v38 = vmul.f32 %v185_v34, %v748_v1  ;;  %v642_v40 = vpop.eup %641  ;;  %v123_v41 = vmul.f32 %v640_v35, %v122_v13  ;;  %s867_s29 = sld [smem:[#allocation2 + $0x18]] }
  0x29   :  { %647 = vtanh.f32 %v157_v33  ;;  %v192_v43 = vstv %s843_s22  ;;  %v124_v46 = vmul.f32 %v642_v40, %v122_v13  ;;  %v198_v48 = vstv %s846_s23  ;;  %s881_s6 = sld [smem:[#allocation2 + $0x41]] }
  0x2a   :  { %649 = vtanh.f32 %v158_v36  ;;  %v189_v47 = vadd.f32 %v188_v39, %v186_v37  ;;  %v167_v50 = vadd.f32 %v123_v41, %v103_v31  ;;  %v190_v51 = vadd.f32 %v188_v39, %v187_v38  ;;  %s885_s7 = sld [smem:[#allocation2 + $0x21]] }
  0x2b   :  { %v644_v49 = vpop.eup %643  ;;  %v193_v52 = vmul.f32 %v755_v3, %v192_v43  ;;  %v194_v53 = vmul.f32 %v760_v4, %v192_v43  ;;  %v162_v55 = vstv %s850_s24  ;;  %v166_v56 = vadd.f32 %v84_v25, %v64_v21  ;;  %s888_s1 = sld [smem:[#allocation2 + $0x22]] }
  0x2c   :  { %v646_v54 = vpop.eup %645  ;;  %v168_v57 = vadd.f32 %v124_v46, %v104_v32  ;;  %v143_v58 = vmul.f32 %v644_v49, %v142_v28  ;;  %v199_v60 = vmul.f32 %v873_v44, %v198_v48  ;;  %v200_v61 = vmul.f32 %v878_v45, %v198_v48  ;;  %s897_s8 = sld [smem:[#allocation2 + $0x23]] }
  0x2d   :  { %v144_v59 = vmul.f32 %v646_v54, %v142_v28  ;;  %v195_v62 = vadd.f32 %v193_v52, %v189_v47  ;;  %v211_v63 = vstv %s857_s26  ;;  %v214_v2 = vstv %s853_s25  ;;  %s899_s9 = sld [smem:[#allocation2 + $0x4b]] }
  0x2e   :  { %v218_v5 = vstv %s860_s27  ;;  %v171_v7 = vadd.f32 %v167_v50, %v165_v42  ;;  %v196_v8 = vadd.f32 %v194_v53, %v190_v51  ;;  %v212_v9 = vmul.f32 %v211_v63, %v743_v0  ;;  %s904_s10 = sld [smem:[#allocation2 + $0x42]] }
  0x2f   :  { %v648_v6 = vpop.eup %647  ;;  %v213_v10 = vmul.f32 %v211_v63, %v748_v1  ;;  %v172_v13 = vadd.f32 %v168_v57, %v166_v56  ;;  %v219_v14 = vmul.f32 %v755_v3, %v218_v5  ;;  %v224_v15 = vstv %s865_s28  ;;  %s907_s11 = sld [smem:[#allocation2 + $0x24]] }
  0x30   :  { %v650_v11 = vpop.eup %649  ;;  %v163_v12 = vmul.f32 %v648_v6, %v162_v55  ;;  %v215_v17 = vadd.f32 %v214_v2, %v212_v9  ;;  %v220_v19 = vmul.f32 %v760_v4, %v218_v5  ;;  %v176_v21 = vstv %s867_s29  ;;  %s910_s12 = sld [smem:[#allocation2 + $0x25]] }
  0x31   :  { %v164_v16 = vmul.f32 %v650_v11, %v162_v55  ;;  %v216_v18 = vadd.f32 %v214_v2, %v213_v10  ;;  %v201_v22 = vadd.f32 %v199_v60, %v195_v62  ;;  %v202_v24 = vadd.f32 %v200_v61, %v196_v8  ;;  %s915_s13 = sld [smem:[#allocation2 + $0x26]] }
  0x32   :  { %v169_v20 = vadd.f32 %v163_v12, %v143_v58  ;;  %v221_v25 = vadd.f32 %v219_v14, %v215_v17  ;;  %v225_v26 = vmul.f32 %v873_v44, %v224_v15  ;;  %v237_v28 = vstv %s885_s7  ;;  %s918_s14 = sld [smem:[#allocation2 + $0x4c]] }
  0x33   :  { %v170_v23 = vadd.f32 %v164_v16, %v144_v59  ;;  %v240_v29 = vstv %s881_s6  ;;  %v244_v30 = vstv %s888_s1  ;;  %v222_v32 = vadd.f32 %v220_v19, %v216_v18  ;;  %s923_s15 = sld [smem:[#allocation2 + $0x4d]] }
  0x34   :  { %v173_v27 = vadd.f32 %v171_v7, %v169_v20  ;;  %v226_v33 = vmul.f32 %v878_v45, %v224_v15  ;;  %v238_v34 = vmul.f32 %v237_v28, %v743_v0  ;;  %651 = vtanh.f32 %v201_v22  ;;  %s926_s16 = sld [smem:[#allocation2 + $0x27]] }
  0x35   :  { %v174_v31 = vadd.f32 %v172_v13, %v170_v23  ;;  %v239_v36 = vmul.f32 %v237_v28, %v748_v1  ;;  %v245_v37 = vmul.f32 %v755_v3, %v244_v30  ;;  %653 = vtanh.f32 %v202_v24  ;;  %s928_s17 = sld [smem:[#allocation2 + $0x43]] }
  0x36   :  { %v177_v35 = vadd.f32 %v176_v21, %v173_v27  ;;  %v241_v39 = vadd.f32 %v240_v29, %v238_v34  ;;  %v250_v40 = vstv %s897_s8  ;;  %v227_v41 = vadd.f32 %v225_v26, %v221_v25  ;;  %s931_s18 = sld [smem:[#allocation2 + $0x28]] }
  0x37   :  { %v178_v38 = vadd.f32 %v176_v21, %v174_v31  ;;  %v228_v42 = vadd.f32 %v226_v33, %v222_v32  ;;  %v246_v43 = vmul.f32 %v760_v4, %v244_v30  ;;  %v242_v46 = vadd.f32 %v240_v29, %v239_v36  ;;  %s935_s19 = sld [smem:[#allocation2 + $0x4e]] }
  0x38   :  { %655 = vtanh.f32 %v177_v35  ;;  %v247_v47 = vadd.f32 %v245_v37, %v241_v39  ;;  %v251_v48 = vmul.f32 %v873_v44, %v250_v40  ;;  %v263_v49 = vstv %s907_s11  ;;  %s940_s20 = sld [smem:[#allocation2 + $0x29]] }
  0x39   :  { %657 = vtanh.f32 %v178_v38  ;;  %v264_v50 = vmul.f32 %v263_v49, %v743_v0  ;;  %v265_v51 = vmul.f32 %v263_v49, %v748_v1  ;;  %v266_v52 = vstv %s904_s10  ;;  %s944_s21 = sld [smem:[#allocation2 + $0x4f]] }
  0x3a   :  { %v652_v53 = vpop.eup %651  ;;  %659 = vtanh.f32 %v227_v41  ;;  %v270_v54 = vstv %s910_s12  ;;  %v276_v55 = vstv %s915_s13  ;;  %v206_v57 = vstv %s899_s9  ;;  %s949_s0 = sld [smem:[#allocation2 + $0x2a]] }
  0x3b   :  { %v654_v56 = vpop.eup %653  ;;  %v252_v58 = vmul.f32 %v878_v45, %v250_v40  ;;  %v267_v59 = vadd.f32 %v266_v52, %v264_v50  ;;  %v271_v60 = vmul.f32 %v755_v3, %v270_v54  ;;  %661 = vtanh.f32 %v228_v42  ;;  %s951_s22 = sld [smem:[#allocation2 + $0x2b]] }
  0x3c   :  { %v248_v62 = vadd.f32 %v246_v43, %v242_v46  ;;  %v253_v63 = vadd.f32 %v251_v48, %v247_v47  ;;  %v268_v2 = vadd.f32 %v266_v52, %v265_v51  ;;  %v272_v6 = vmul.f32 %v760_v4, %v270_v54  ;;  %s959_s25 = sld [smem:[#allocation2 + $0x44]] }
  0x3d   :  { %v273_v7 = vadd.f32 %v271_v60, %v267_v59  ;;  %v277_v8 = vmul.f32 %v873_v44, %v276_v55  ;;  %v289_v9 = vstv %s926_s16  ;;  %s966_s28 = sld [smem:[#allocation2 + $0x45]]  ;;  %v232_v12 = vstv %s918_s14 }
  0x3e   :  { %v656_v61 = vpop.eup %655  ;;  %v290_v10 = vmul.f32 %v289_v9, %v743_v0  ;;  %v291_v11 = vmul.f32 %v289_v9, %v748_v1  ;;  %v292_v13 = vstv %s928_s17  ;;  %v296_v14 = vstv %s931_s18  ;;  %s971_s29 = sld [smem:[#allocation2 + $0x2d]] }
  0x3f   :  { %v658_v5 = vpop.eup %657  ;;  %181 = vst [vmem:[%s1183_s2] sm:$0xff] %v656_v61  ;;  %v973_v16 = vmul.f32 %v652_v53, %v206_v57  ;;  %v975_v17 = vmul.f32 %v654_v56, %v206_v57  ;;  %v254_v18 = vadd.f32 %v252_v58, %v248_v62  ;;  %663 = vtanh.f32 %v253_v63  ;;  %s977_s30 = sld [smem:[#allocation2 + $0x2c]] }
  0x40   :  { %182 = vst [vmem:[%s1183_s2 + $0x8] sm:$0xff] %v658_v5  ;;  %v660_v15 = vpop.eup %659  ;;  %v258_v19 = vstv %s923_s15  ;;  %v274_v20 = vadd.f32 %v272_v6, %v268_v2  ;;  %v278_v21 = vmul.f32 %v878_v45, %v276_v55  ;;  %v279_v22 = vadd.f32 %v277_v8, %v273_v7  ;;  %s981_s3 = sld [smem:[#allocation2 + $0x2e]] }
  0x41   :  { %v662_v23 = vpop.eup %661  ;;  %v293_v24 = vadd.f32 %v292_v13, %v290_v10  ;;  %v294_v25 = vadd.f32 %v292_v13, %v291_v11  ;;  %v297_v26 = vmul.f32 %v755_v3, %v296_v14  ;;  %v298_v27 = vmul.f32 %v760_v4, %v296_v14  ;;  %s985_s4 = sld [smem:[#allocation2 + $0x2f]] }
  0x42   :  { %v987_v28 = vmul.f32 %v660_v15, %v232_v12  ;;  %v284_v29 = vstv %s935_s19  ;;  %v302_v30 = vstv %s940_s20  ;;  %v315_v31 = vstv %s949_s0  ;;  %s992_s5 = sld [smem:[#allocation2 + $0x50]] }
  0x43   :  { %665 = vtanh.f32 %v254_v18  ;;  %v316_v32 = vmul.f32 %v315_v31, %v743_v0  ;;  %v317_v33 = vmul.f32 %v315_v31, %v748_v1  ;;  %v322_v34 = vstv %s951_s22  ;;  %s997_s6 = sld [smem:[#allocation2 + $0x30]] }
  0x44   :  { %v999_v35 = vmul.f32 %v662_v23, %v232_v12  ;;  %v280_v36 = vadd.f32 %v278_v21, %v274_v20  ;;  %667 = vtanh.f32 %v279_v22  ;;  %v318_v37 = vstv %s959_s25  ;;  %s1002_s7 = sld [smem:[#allocation2 + $0x46]] }
  0x45   :  { %v664_v38 = vpop.eup %663  ;;  %v299_v39 = vadd.f32 %v297_v26, %v293_v24  ;;  %v300_v40 = vadd.f32 %v298_v27, %v294_v25  ;;  %v303_v41 = vmul.f32 %v873_v44, %v302_v30  ;;  %v304_v42 = vmul.f32 %v878_v45, %v302_v30  ;;  %s1006_s1 = sld [smem:[#allocation2 + $0x31]] }
  0x46   :  { %v323_v43 = vmul.f32 %v755_v3, %v322_v34  ;;  %v324_v46 = vmul.f32 %v760_v4, %v322_v34  ;;  %v341_v47 = vstv %s971_s29  ;;  %v344_v48 = vstv %s966_s28  ;;  %s1012_s8 = sld [smem:[#allocation2 + $0x32]] }
  0x47   :  { %v319_v49 = vadd.f32 %v318_v37, %v316_v32  ;;  %v320_v50 = vadd.f32 %v318_v37, %v317_v33  ;;  %v328_v51 = vstv %s977_s30  ;;  %v342_v52 = vmul.f32 %v341_v47, %v743_v0  ;;  %s1023_s9 = sld [smem:[#allocation2 + $0x47]] }
  0x48   :  { %v1018_v53 = vmul.f32 %v664_v38, %v258_v19  ;;  %v310_v54 = vstv %s944_s21  ;;  %v343_v55 = vmul.f32 %v341_v47, %v748_v1  ;;  %v348_v56 = vstv %s981_s3  ;;  %s1027_s10 = sld [smem:[#allocation2 + $0x33]] }
  0x49   :  { %v666_v57 = vpop.eup %665  ;;  %669 = vtanh.f32 %v280_v36  ;;  %v345_v58 = vadd.f32 %v344_v48, %v342_v52  ;;  %v349_v59 = vmul.f32 %v755_v3, %v348_v56  ;;  %v354_v60 = vstv %s985_s4  ;;  %s1031_s11 = sld [smem:[#allocation2 + $0x34]] }
  0x4a   :  { %v668_v61 = vpop.eup %667  ;;  %v305_v62 = vadd.f32 %v303_v41, %v299_v39  ;;  %v306_v63 = vadd.f32 %v304_v42, %v300_v40  ;;  %v329_v2 = vmul.f32 %v873_v44, %v328_v51  ;;  %v330_v5 = vmul.f32 %v878_v45, %v328_v51  ;;  %s1033_s12 = sld [smem:[#allocation2 + $0x51]] }
  0x4b   :  { %v325_v6 = vadd.f32 %v323_v43, %v319_v49  ;;  %v326_v7 = vadd.f32 %v324_v46, %v320_v50  ;;  %v346_v8 = vadd.f32 %v344_v48, %v343_v55  ;;  %v367_v9 = vstv %s997_s6  ;;  %s1039_s13 = sld [smem:[#allocation2 + $0x35]] }
  0x4c   :  { %v350_v10 = vmul.f32 %v760_v4, %v348_v56  ;;  %v351_v11 = vadd.f32 %v349_v59, %v345_v58  ;;  %v355_v12 = vmul.f32 %v873_v44, %v354_v60  ;;  %v368_v13 = vmul.f32 %v367_v9, %v743_v0  ;;  %s1048_s14 = sld [smem:[#allocation2 + $0x48]] }
  0x4d   :  { %v1043_v14 = vmul.f32 %v666_v57, %v258_v19  ;;  %v336_v15 = vstv %s992_s5  ;;  %v369_v18 = vmul.f32 %v367_v9, %v748_v1  ;;  %v370_v20 = vstv %s1002_s7  ;;  %s1052_s16 = sld [smem:[#allocation2 + $0x36]] }
  0x4e   :  { %671 = vtanh.f32 %v305_v62  ;;  %v371_v21 = vadd.f32 %v370_v20, %v368_v13  ;;  %v374_v22 = vstv %s1006_s1  ;;  %v380_v23 = vstv %s1012_s8  ;;  %s1055_s15 = sld [smem:[#allocation2 + $0x37]] }
  0x4f   :  { %v670_v24 = vpop.eup %669  ;;  %673 = vtanh.f32 %v306_v63  ;;  %v331_v25 = vadd.f32 %v329_v2, %v325_v6  ;;  %v332_v19 = vadd.f32 %v330_v5, %v326_v7  ;;  %v375_v26 = vmul.f32 %v755_v3, %v374_v22  ;;  %s1062_s17 = sld [smem:[#allocation2 + $0x38]] }
  0x50   :  { %v352_v27 = vadd.f32 %v350_v10, %v346_v8  ;;  %v356_v30 = vmul.f32 %v878_v45, %v354_v60  ;;  %v357_v31 = vadd.f32 %v355_v12, %v351_v11  ;;  %v372_v32 = vadd.f32 %v370_v20, %v369_v18  ;;  %s1067_s18 = sld [smem:[#allocation2 + $0x49]] }
  0x51   :  { %v376_v33 = vmul.f32 %v760_v4, %v374_v22  ;;  %v381_v34 = vmul.f32 %v873_v44, %v380_v23  ;;  %v393_v36 = vstv %s1027_s10  ;;  %v396_v37 = vstv %s1023_s9  ;;  %s1078_s20 = sld [smem:[#allocation2 + $0x39]] }
  0x52   :  { %v377_v38 = vadd.f32 %v375_v26, %v371_v21  ;;  %v394_v39 = vmul.f32 %v393_v36, %v743_v0  ;;  %v395_v40 = vmul.f32 %v393_v36, %v748_v1  ;;  %v400_v41 = vstv %s1031_s11  ;;  %s1081_s0 = sld [smem:[#allocation2 + $0x3a]] }
  0x53   :  { %v1071_v42 = vmul.f32 %v668_v61, %v284_v29  ;;  %v1075_v43 = vmul.f32 %v670_v24, %v284_v29  ;;  %675 = vtanh.f32 %v331_v25  ;;  %v401_v46 = vmul.f32 %v755_v3, %v400_v41  ;;  %s1087_s19 = sld [smem:[#allocation2 + $0x3b]] }
  0x54   :  { %v672_v47 = vpop.eup %671  ;;  %677 = vtanh.f32 %v332_v19  ;;  %v358_v48 = vadd.f32 %v356_v30, %v352_v27  ;;  %v397_v49 = vadd.f32 %v396_v37, %v394_v39  ;;  %v406_v50 = vstv %s1039_s13  ;;  %s1091_s22 = sld [smem:[#allocation2 + $0x52]] }
  0x55   :  { %v1083_v51 = vpop.eup %673  ;;  %679 = vtanh.f32 %v357_v31  ;;  %v362_v29 = vstv %s1033_s12  ;;  %v378_v52 = vadd.f32 %v376_v33, %v372_v32  ;;  %v382_v55 = vmul.f32 %v878_v45, %v380_v23  ;;  %s1102_s23 = sld [smem:[#allocation2 + $0x3c]] }
  0x56   :  { %v383_v56 = vadd.f32 %v381_v34, %v377_v38  ;;  %v398_v57 = vadd.f32 %v396_v37, %v395_v40  ;;  %v402_v58 = vmul.f32 %v760_v4, %v400_v41  ;;  %v407_v59 = vmul.f32 %v873_v44, %v406_v50  ;;  %s1109_s24 = sld [smem:[#allocation2 + $0x4a]] }
  0x57   :  { %v403_v60 = vadd.f32 %v401_v46, %v397_v49  ;;  %v419_v61 = vstv %s1052_s16  ;;  %v422_v62 = vstv %s1048_s14  ;;  %v426_v63 = vstv %s1055_s15  ;;  %s1114_s25 = sld [smem:[#allocation2 + $0x3d]] }
  0x58   :  { %v1098_v2 = vmul.f32 %v672_v47, %v310_v54  ;;  %681 = vtanh.f32 %v358_v48  ;;  %v420_v5 = vmul.f32 %v419_v61, %v743_v0  ;;  %v421_v6 = vmul.f32 %v419_v61, %v748_v1  ;;  %s1118_s26 = sld [smem:[#allocation2 + $0x3e]] }
  0x59   :  { %v1104_v7 = vpop.eup %675  ;;  %v384_v8 = vadd.f32 %v382_v55, %v378_v52  ;;  %v427_v9 = vmul.f32 %v755_v3, %v426_v63  ;;  %v428_v10 = vmul.f32 %v760_v4, %v426_v63  ;;  %v432_v11 = vstv %s1062_s17  ;;  %s1131_s27 = sld [smem:[#allocation2 + $0x53]] }
  0x5a   :  { %v1111_v12 = vpop.eup %677  ;;  %v404_v13 = vadd.f32 %v402_v58, %v398_v57  ;;  %v408_v18 = vmul.f32 %v878_v45, %v406_v50  ;;  %v423_v20 = vadd.f32 %v422_v62, %v420_v5  ;;  %v424_v21 = vadd.f32 %v422_v62, %v421_v6  ;;  %s1134_s28 = sld [smem:[#allocation2 + $0x54]] }
  0x5b   :  { %v680_v22 = vpop.eup %679  ;;  %683 = vtanh.f32 %v383_v56  ;;  %v409_v23 = vadd.f32 %v407_v59, %v403_v60  ;;  %v445_v24 = vstv %s1078_s20  ;;  %v448_v25 = vstv %s1067_s18  ;;  %s1137_s29 = sld [smem:[#allocation2 + $0x55]] }
  0x5c   :  { %v429_v19 = vadd.f32 %v427_v9, %v423_v20  ;;  %v433_v26 = vmul.f32 %v873_v44, %v432_v11  ;;  %v434_v27 = vmul.f32 %v878_v45, %v432_v11  ;;  %v446_v30 = vmul.f32 %v445_v24, %v743_v0  ;;  %s1153_s30 = sld [smem:[#allocation2 + $0x56]] }
  0x5d   :  { %v430_v31 = vadd.f32 %v428_v10, %v424_v21  ;;  %v447_v32 = vmul.f32 %v445_v24, %v748_v1  ;;  %v452_v33 = vstv %s1081_s0  ;;  %v458_v34 = vstv %s1087_s19  ;;  %s623_s21 = sld [smem:[#allocation2 + $0x57]] }
  0x5e   :  { %v682_v36 = vpop.eup %681  ;;  %685 = vtanh.f32 %v384_v8  ;;  %v410_v37 = vadd.f32 %v408_v18, %v404_v13  ;;  %v449_v38 = vadd.f32 %v448_v25, %v446_v30  ;;  %v453_v39 = vmul.f32 %v755_v3, %v452_v33 }
  0x5f   :  { %v450_v40 = vadd.f32 %v448_v25, %v447_v32  ;;  %v454_v41 = vmul.f32 %v760_v4, %v452_v33  ;;  %v459_v46 = vmul.f32 %v873_v44, %v458_v34  ;;  %v460_v47 = vmul.f32 %v878_v45, %v458_v34 }
  0x60   :  { %v388_v48 = vstv %s1091_s22  ;;  %v435_v49 = vadd.f32 %v433_v26, %v429_v19  ;;  %v455_v50 = vadd.f32 %v453_v39, %v449_v38  ;;  %v471_v52 = vstv %s1102_s23 }
  0x61   :  { %v684_v55 = vpop.eup %683  ;;  %687 = vtanh.f32 %v409_v23  ;;  %v436_v56 = vadd.f32 %v434_v27, %v430_v31  ;;  %v456_v57 = vadd.f32 %v454_v41, %v450_v40  ;;  %v472_v58 = vmul.f32 %v471_v52, %v743_v0 }
  0x62   :  { %689 = vtanh.f32 %v410_v37  ;;  %v461_v59 = vadd.f32 %v459_v46, %v455_v50  ;;  %v473_v60 = vmul.f32 %v471_v52, %v748_v1  ;;  %v474_v61 = vstv %s1109_s24 }
  0x63   :  { %v462_v62 = vadd.f32 %v460_v47, %v456_v57  ;;  %v475_v63 = vadd.f32 %v474_v61, %v472_v58  ;;  %v478_v5 = vstv %s1114_s25  ;;  %v484_v6 = vstv %s1118_s26 }
  0x64   :  { %v686_v8 = vpop.eup %685  ;;  %691 = vtanh.f32 %v435_v49  ;;  %v476_v9 = vadd.f32 %v474_v61, %v473_v60  ;;  %v479_v10 = vmul.f32 %v755_v3, %v478_v5  ;;  %v480_v0 = vmul.f32 %v760_v4, %v478_v5 }
  0x65   :  { %v312_v11 = vmul.f32 %v1083_v51, %v310_v54  ;;  %693 = vtanh.f32 %v436_v56  ;;  %v485_v1 = vmul.f32 %v873_v44, %v484_v6  ;;  %v486_v13 = vmul.f32 %v878_v45, %v484_v6 }
  0x66   :  { %v337_v18 = vmul.f32 %v1104_v7, %v336_v15  ;;  %695 = vtanh.f32 %v461_v59  ;;  %v481_v20 = vadd.f32 %v479_v10, %v475_v63  ;;  %v482_v3 = vadd.f32 %v480_v0, %v476_v9 }
  0x67   :  { %v688_v4 = vpop.eup %687  ;;  %v338_v54 = vmul.f32 %v1111_v12, %v336_v15  ;;  %v363_v51 = vmul.f32 %v680_v22, %v362_v29  ;;  %v389_v44 = vmul.f32 %v684_v55, %v388_v48  ;;  %697 = vtanh.f32 %v462_v62 }
  0x68   :  { %v690_v45 = vpop.eup %689  ;;  %v364_v21 = vmul.f32 %v682_v36, %v362_v29  ;;  %v390_v23 = vmul.f32 %v686_v8, %v388_v48  ;;  %v487_v7 = vadd.f32 %v485_v1, %v481_v20  ;;  %v488_v24 = vadd.f32 %v486_v13, %v482_v3 }
  0x69   :  { %v414_v25 = vstv %s1131_s27  ;;  %v440_v26 = vstv %s1134_s28  ;;  %v466_v27 = vstv %s1137_s29  ;;  %v495_v30 = vadd.f32 %v987_v28, %v973_v16 }
  0x6a   :  { %v692_v19 = vpop.eup %691  ;;  %699 = vtanh.f32 %v487_v7  ;;  %v497_v12 = vadd.f32 %v1071_v42, %v1018_v53  ;;  %v499_v22 = vadd.f32 %v337_v18, %v1098_v2  ;;  %v501_v29 = vadd.f32 %v389_v44, %v363_v51 }
  0x6b   :  { %v694_v15 = vpop.eup %693  ;;  %701 = vtanh.f32 %v488_v24  ;;  %v496_v32 = vadd.f32 %v999_v35, %v975_v17  ;;  %v498_v33 = vadd.f32 %v1075_v43, %v1043_v14  ;;  %v500_v34 = vadd.f32 %v338_v54, %v312_v11 }
  0x6c   :  { %v696_v31 = vpop.eup %695  ;;  %v502_v36 = vadd.f32 %v390_v23, %v364_v21  ;;  %v415_v16 = vmul.f32 %v688_v4, %v414_v25  ;;  %v441_v28 = vmul.f32 %v692_v19, %v440_v26  ;;  %v416_v38 = vmul.f32 %v690_v45, %v414_v25 }
  0x6d   :  { %v698_v37 = vpop.eup %697  ;;  %v442_v39 = vmul.f32 %v694_v15, %v440_v26  ;;  %v492_v40 = vstv %s1153_s30  ;;  %v467_v53 = vmul.f32 %v696_v31, %v466_v27  ;;  %v507_v42 = vadd.f32 %v497_v12, %v495_v30 }
  0x6e   :  { %v509_v2 = vadd.f32 %v501_v29, %v499_v22  ;;  %v468_v46 = vmul.f32 %v698_v37, %v466_v27  ;;  %v508_v47 = vadd.f32 %v498_v33, %v496_v32  ;;  %v510_v48 = vadd.f32 %v502_v36, %v500_v34 }
  0x6f   :  { %v503_v49 = vadd.f32 %v441_v28, %v415_v16  ;;  %v504_v43 = vadd.f32 %v442_v39, %v416_v38  ;;  %v518_v59 = vstv %s623_s21 }
  0x70   :  { %v700_v41 = vpop.eup %699  ;;  %v513_v52 = vadd.f32 %v509_v2, %v507_v42  ;;  %v514_v56 = vadd.f32 %v510_v48, %v508_v47 }
  0x71   :  { %v702_v17 = vpop.eup %701  ;;  %v493_v35 = vmul.f32 %v700_v41, %v492_v40 }
  0x72   :  { %v494_v14 = vmul.f32 %v702_v17, %v492_v40 }
  0x73   :  { %v505_v50 = vadd.f32 %v493_v35, %v467_v53 }
  0x74   :  { %v506_v55 = vadd.f32 %v494_v14, %v468_v46 }
  0x75   :  { %v511_v57 = vadd.f32 %v505_v50, %v503_v49 }
  0x76   :  { %v512_v58 = vadd.f32 %v506_v55, %v504_v43 }
  0x77   :  { %v515_v60 = vadd.f32 %v513_v52, %v511_v57 }
  0x78   :  { %v516_v61 = vadd.f32 %v514_v56, %v512_v58 }
  0x79   :  { %v519_v62 = vadd.f32 %v518_v59, %v515_v60 }
  0x7a   :  { %v520_v63 = vadd.f32 %v518_v59, %v516_v61 }
  0x7b   :  { %703 = vtanh.f32 %v519_v62 }
  0x7c   :  { %705 = vtanh.f32 %v520_v63 }
  0x81   :  { %v704_v5 = vpop.eup %703 }
  0x82   :  { %v706_v6 = vpop.eup %705  ;;  %624 = vst [vmem:[%s1183_s2 + $0x20] sm:$0xff] %v704_v5 }
  0x83   :  { %625 = vst [vmem:[%s1183_s2 + $0x28] sm:$0xff] %v706_v6 }
  0x84   :  { %530 = vsyncpa [#allocation3], 1 }

</bundles_post_ra>
